<compile_context>
chip_gen: v7x
topology: tpu7x:2x2x1
jax: 0.10.0
libtpu: 0.0.40
codegen_flags: <defaults>
</compile_context>

<pallas_src>
import functools

import jax
import jax.numpy as jnp
from jax import lax
from jax.experimental import pallas as pl
from jax.experimental.pallas import tpu as pltpu


def _downblock_kernel(wq, xp_ref, w1_ref, b1_ref, w2_ref, b2_ref, m_ref, o_ref, buf_ref):
    # xp_ref : (1, Cin, S) bf16  pooled input, channel-major, flat spatial (S = Hp*Wq,
    #                            Wq = Wp+1 with a zero separator column per row)
    # w*_ref : (Cout, 9*C) bf16  tap-major im2col weights, BN scale folded in
    # b*_ref : (Cout, 1)   f32   folded conv-bias + BN shift
    # m_ref  : (1, S)      f32   1.0 on valid columns, 0.0 on separator columns
    # o_ref  : (1, Cout, S) bf16 lane-dense output (spatial on lanes)
    # buf_ref: (Cmax, L)   bf16  flat zero-halo activation scratch, L = (Hp+2)*Wq + 2
    _, cin, S = xp_ref.shape
    cout = o_ref.shape[1]
    cmax, L = buf_ref.shape

    # Zero the halo regions (1 elem + padded row above, padded row + 1 elem below).  The
    # interior -- including the separator columns -- is fully overwritten below.  Done every
    # step (not only step 0) so it stays correct when the "parallel" batch axis is sharded
    # across TensorCores.  Both stores are lane-contiguous (no narrow column stores).
    z = jnp.zeros((cmax, wq + 1), buf_ref.dtype)
    buf_ref[:, 0:wq + 1] = z
    buf_ref[:, L - (wq + 1):L] = z

    def conv3x3(c, w_ref):
        # Tap (dy, dx) of the SAME-padded 3x3 conv is the contiguous lane slice of the
        # scratch starting at dy*wq + dx.  Weight columns are grouped tap-major.
        if 9 * c <= 512:
            # Tiny channels: one fat-K matmul (K = 9c) keeps the MXU pipeline filled.
            slab = jnp.concatenate(
                [buf_ref[0:c, dy * wq + dx: dy * wq + dx + S]
                 for dy in range(3) for dx in range(3)], axis=0)          # (9c, S) bf16
            return jnp.dot(w_ref[...], slab, preferred_element_type=jnp.float32)
        # Real channel counts: 9-tap accumulation, no 9x slab in VMEM.
        acc = None
        for t in range(9):
            dy, dx = divmod(t, 3)
            part = jnp.dot(w_ref[:, t * c:(t + 1) * c],
                           buf_ref[0:c, dy * wq + dx: dy * wq + dx + S],
                           preferred_element_type=jnp.float32)            # (Cout, S) f32
            acc = part if acc is None else acc + part
        return acc

    # ---- conv1 (BN1 scale pre-folded into w1) -> bias -> LeakyReLU(0.01) ----
    buf_ref[0:cin, wq + 1: wq + 1 + S] = xp_ref[0]
    h1 = conv3x3(cin, w1_ref) + b1_ref[...]
    h1 = jnp.where(h1 >= 0, h1, 0.01 * h1)
    # TODO(synk): train-mode dropout not implemented; eval mode -> identity.

    # ---- conv2 (BN2 scale pre-folded into w2) -> bias -> LeakyReLU(0.01) ----
    h1 = h1 * m_ref[...]                        # zero separator/junk columns before reuse
    buf_ref[0:cout, wq + 1: wq + 1 + S] = h1.astype(buf_ref.dtype)
    h2 = conv3x3(cout, w2_ref) + b2_ref[...]
    h2 = jnp.where(h2 >= 0, h2, 0.01 * h2)

    # Lane-dense (Cout, S) store -- no transpose; the wrapper strips the separator columns.
    o_ref[0] = h2.astype(o_ref.dtype)


def downblock_forward(x_nchw, params, out_dtype=jnp.bfloat16):
    """DownBlock forward (eval mode) on an NCHW input. Returns NCHW (bf16 by default)."""
    (w1, b1, g1, be1, m1, v1, w2, b2, g2, be2, m2, v2) = params
    eps = 1e-5
    N, Cin, H, W = x_nchw.shape
    Hp, Wp = H // 2, W // 2
    Wq = Wp + 1                      # +1 zero separator column per row (SAME padding in W)
    S = Hp * Wq
    L = (Hp + 2) * Wq + 2            # flat scratch length: halo rows + 1 guard elem each end
    Cout = w1.shape[0]
    Cmax = max(Cin, Cout)

    # ---- MaxPool2d(2) (floor), channel-major, flat spatial, bf16; done as one fused XLA
    #      pass that shrinks the kernel's HBM input 4x and writes the separator zeros.
    xp = x_nchw[:, :, :2 * Hp, :2 * Wp].reshape(N, Cin, Hp, 2, Wp, 2).max(axis=(3, 5))
    xp = jnp.pad(xp, ((0, 0), (0, 0), (0, 0), (0, Wq - Wp)))
    xp = xp.reshape(N, Cin, S).astype(jnp.bfloat16)

    # ---- fold eval-mode BatchNorm: scale into the weights, shift (+conv bias) into the bias.
    s1 = g1 / jnp.sqrt(v1 + eps)
    s2 = g2 / jnp.sqrt(v2 + eps)
    w1_mat = (jnp.transpose(w1, (0, 2, 3, 1)).reshape(Cout, 9 * Cin)
              * s1[:, None]).astype(jnp.bfloat16)                 # (Cout, 9*Cin), tap-major
    w2_mat = (jnp.transpose(w2, (0, 2, 3, 1)).reshape(Cout, 9 * Cout)
              * s2[:, None]).astype(jnp.bfloat16)
    bb1 = (be1 + s1 * (b1 - m1)).astype(jnp.float32).reshape(Cout, 1)
    bb2 = (be2 + s2 * (b2 - m2)).astype(jnp.float32).reshape(Cout, 1)

    # valid-column mask: 1.0 for x < Wp within each Wq-strided row, 0.0 for separators.
    cmask = ((jnp.arange(S, dtype=jnp.int32) % Wq) < Wp).astype(jnp.float32).reshape(1, S)

    # ---- VMEM budget: double-buffered activation blocks, single-buffered constants,
    #      scratch, plus the live f32 accumulators / intermediates and tap slices.
    bytes_in = 2 * Cin * S * 2
    bytes_out = 2 * Cout * S * 2
    bytes_const = (9 * Cin * Cout + 9 * Cout * Cout) * 2 + 2 * Cout * 4 + S * 4
    bytes_buf = Cmax * L * 2
    bytes_live = 3 * Cout * S * 4 + 9 * Cmax * S * 2
    need = bytes_in + bytes_out + bytes_const + bytes_buf + bytes_live
    try:
        vmem_cap = pltpu.get_tpu_info().vmem_capacity_bytes
    except Exception:
        vmem_cap = 64 * 2 ** 20      # conservative fallback (v7x per-core VMEM)
    vmem_limit = int(min(max(1.25 * need + 4 * 2 ** 20, 32 * 2 ** 20), 0.75 * vmem_cap))

    kern = functools.partial(_downblock_kernel, Wq)

    def call(single_buffer_consts):
        const_kw = {"pipeline_mode": pl.Buffered(1)} if single_buffer_consts else {}

        def const_spec(shape):
            return pl.BlockSpec(shape, lambda n: (0,) * len(shape), **const_kw)

        return pl.pallas_call(
            kern,
            out_shape=jax.ShapeDtypeStruct((N, Cout, S), out_dtype),
            grid=(N,),
            in_specs=[
                pl.BlockSpec((1, Cin, S), lambda n: (n, 0, 0)),
                const_spec((Cout, 9 * Cin)),
                const_spec((Cout, 1)),
                const_spec((Cout, 9 * Cout)),
                const_spec((Cout, 1)),
                const_spec((1, S)),
            ],
            out_specs=pl.BlockSpec((1, Cout, S), lambda n: (n, 0, 0)),
            scratch_shapes=[pltpu.VMEM((Cmax, L), jnp.bfloat16)],
            compiler_params=pltpu.CompilerParams(
                dimension_semantics=("parallel",),
                vmem_limit_bytes=vmem_limit),
        )(xp, w1_mat, bb1, w2_mat, bb2, cmask)

    try:
        # Grid-invariant operands single-buffered (halves their VMEM; matters most on v7x).
        out_flat = call(True)
    except Exception:
        # pl.Buffered(1) not supported by this jax/libtpu build -> default double buffering.
        out_flat = call(False)

    # Strip the separator columns; layout is already channel-major NCHW.
    return out_flat.reshape(N, Cout, Hp, Wq)[..., :Wp]


def downblock_ref(x, params):
    """Pure-JAX reference (NCHW), eval-mode semantics."""
    (w1, b1, g1, be1, m1, v1, w2, b2, g2, be2, m2, v2) = params
    eps = 1e-5
    N, C, H, W = x.shape
    p = x.reshape(N, C, H // 2, 2, W // 2, 2).max(axis=(3, 5))

    def conv_bn_lrelu(y, w, b, g, be, m, v):
        y = lax.conv_general_dilated(y, w, (1, 1), 'SAME',
                                     dimension_numbers=('NCHW', 'OIHW', 'NCHW'))
        y = y + b[None, :, None, None]
        y = (y - m[None, :, None, None]) / jnp.sqrt(v + eps)[None, :, None, None]
        y = y * g[None, :, None, None] + be[None, :, None, None]
        return jnp.where(y >= 0, y, 0.01 * y)

    y = conv_bn_lrelu(p, w1, b1, g1, be1, m1, v1)
    y = conv_bn_lrelu(y, w2, b2, g2, be2, m2, v2)
    return y


def init_params(key, in_channels, out_channels):
    ks = jax.random.split(key, 12)
    w1 = 0.1 * jax.random.normal(ks[0], (out_channels, in_channels, 3, 3), jnp.float32)
    b1 = 0.1 * jax.random.normal(ks[1], (out_channels,), jnp.float32)
    g1 = 1.0 + 0.1 * jax.random.normal(ks[2], (out_channels,), jnp.float32)
    be1 = 0.1 * jax.random.normal(ks[3], (out_channels,), jnp.float32)
    m1 = 0.1 * jax.random.normal(ks[4], (out_channels,), jnp.float32)
    v1 = jax.random.uniform(ks[5], (out_channels,), jnp.float32, 0.5, 1.5)
    w2 = 0.1 * jax.random.normal(ks[6], (out_channels, out_channels, 3, 3), jnp.float32)
    b2 = 0.1 * jax.random.normal(ks[7], (out_channels,), jnp.float32)
    g2 = 1.0 + 0.1 * jax.random.normal(ks[8], (out_channels,), jnp.float32)
    be2 = 0.1 * jax.random.normal(ks[9], (out_channels,), jnp.float32)
    m2 = 0.1 * jax.random.normal(ks[10], (out_channels,), jnp.float32)
    v2 = jax.random.uniform(ks[11], (out_channels,), jnp.float32, 0.5, 1.5)
    return (w1, b1, g1, be1, m1, v1, w2, b2, g2, be2, m2, v2)


if __name__ == "__main__":
    key = jax.random.PRNGKey(0)
    kx, kp = jax.random.split(key)

    N, Cin, Cout, H, W = 2, 4, 8, 16, 16
    dropout_p = 0.1  # unused in eval-mode forward
    x = jax.random.normal(kx, (N, Cin, H, W), jnp.float32)
    params = init_params(kp, Cin, Cout)

    out = downblock_forward(x, params)
    out = jax.block_until_ready(out)

    ref = downblock_ref(x, params)
    assert out.shape == (N, Cout, H // 2, W // 2), out.shape
    out_f32 = out.astype(jnp.float32)
    # bf16 matmul operands, bf16 h1 requantization, and bf16 output storage (per perf review)
    # bound the deviation from the f32 reference to ~1e-2; tolerance reflects that.
    err = float(jnp.max(jnp.abs(out_f32 - ref)))
    assert jnp.allclose(out_f32, ref, atol=6e-2, rtol=5e-2), err

    print("KERNEL_OK")
</pallas_src>

<mosaic_0001>
module attributes {stable_mosaic.version = 11 : i64} {
  func.func @_downblock_kernel(%arg0: i32, %arg1: memref<1x4x72xbf16, #tpu.memory_space<vmem>>, %arg2: memref<8x36xbf16, #tpu.memory_space<vmem>>, %arg3: memref<8x1xf32, #tpu.memory_space<vmem>>, %arg4: memref<8x72xbf16, #tpu.memory_space<vmem>>, %arg5: memref<8x1xf32, #tpu.memory_space<vmem>>, %arg6: memref<1x72xf32, #tpu.memory_space<vmem>>, %arg7: memref<1x8x72xbf16, #tpu.memory_space<vmem>>, %arg8: memref<8x92xbf16, #tpu.memory_space<vmem>>) attributes {dimension_semantics = [#tpu.dimension_semantics<parallel>], iteration_bounds = array<i64: 2>, scalar_prefetch = 0 : i64, scratch_operands = 1 : i64, tpu.core_type = #tpu.core_type<tc>, window_params = [{transform_indices = @transform_0, window_bounds = array<i64: 1, 4, 72>}, {pipeline_mode = #tpu.pipeline_mode<synchronous>, transform_indices = @transform_1, window_bounds = array<i64: 8, 36>}, {pipeline_mode = #tpu.pipeline_mode<synchronous>, transform_indices = @transform_2, window_bounds = array<i64: 8, 1>}, {pipeline_mode = #tpu.pipeline_mode<synchronous>, transform_indices = @transform_3, window_bounds = array<i64: 8, 72>}, {pipeline_mode = #tpu.pipeline_mode<synchronous>, transform_indices = @transform_4, window_bounds = array<i64: 8, 1>}, {pipeline_mode = #tpu.pipeline_mode<synchronous>, transform_indices = @transform_5, window_bounds = array<i64: 1, 72>}, {transform_indices = @transform_6, window_bounds = array<i64: 1, 8, 72>}]} {
    %cst = arith.constant 0.000000e+00 : bf16
    %0 = vector.broadcast %cst : bf16 to vector<8x10xbf16>
    %c0 = arith.constant 0 : index
    %c0_0 = arith.constant 0 : index
    %1 = vector.load %arg8[%c0, %c0_0] : memref<8x92xbf16, #tpu.memory_space<vmem>>, vector<8x10xbf16>
    tpu.vector_store %arg8[%c0, %c0_0], %0 {strides = array<i32>} : memref<8x92xbf16, #tpu.memory_space<vmem>>, vector<8x10xbf16>,
    %c0_1 = arith.constant 0 : index
    %c82 = arith.constant 82 : index
    %2 = vector.load %arg8[%c0_1, %c82] : memref<8x92xbf16, #tpu.memory_space<vmem>>, vector<8x10xbf16>
    tpu.vector_store %arg8[%c0_1, %c82], %0 {strides = array<i32>} : memref<8x92xbf16, #tpu.memory_space<vmem>>, vector<8x10xbf16>,
    %c0_2 = arith.constant 0 : index
    %c0_3 = arith.constant 0 : index
    %c0_4 = arith.constant 0 : index
    %3 = vector.load %arg1[%c0_2, %c0_3, %c0_4] : memref<1x4x72xbf16, #tpu.memory_space<vmem>>, vector<1x4x72xbf16>
    %4 = vector.shape_cast %3 : vector<1x4x72xbf16> to vector<4x72xbf16>
    %c0_5 = arith.constant 0 : index
    %c10 = arith.constant 10 : index
    %5 = vector.load %arg8[%c0_5, %c10] : memref<8x92xbf16, #tpu.memory_space<vmem>>, vector<4x72xbf16>
    tpu.vector_store %arg8[%c0_5, %c10], %4 {strides = array<i32>} : memref<8x92xbf16, #tpu.memory_space<vmem>>, vector<4x72xbf16>,
    %c0_6 = arith.constant 0 : index
    %c0_7 = arith.constant 0 : index
    %6 = vector.load %arg8[%c0_6, %c0_7] : memref<8x92xbf16, #tpu.memory_space<vmem>>, vector<4x72xbf16>
    %c0_8 = arith.constant 0 : index
    %c1 = arith.constant 1 : index
    %7 = vector.load %arg8[%c0_8, %c1] : memref<8x92xbf16, #tpu.memory_space<vmem>>, vector<4x72xbf16>
    %c0_9 = arith.constant 0 : index
    %c2 = arith.constant 2 : index
    %8 = vector.load %arg8[%c0_9, %c2] : memref<8x92xbf16, #tpu.memory_space<vmem>>, vector<4x72xbf16>
    %c0_10 = arith.constant 0 : index
    %c9 = arith.constant 9 : index
    %9 = vector.load %arg8[%c0_10, %c9] : memref<8x92xbf16, #tpu.memory_space<vmem>>, vector<4x72xbf16>
    %c0_11 = arith.constant 0 : index
    %c10_12 = arith.constant 10 : index
    %10 = vector.load %arg8[%c0_11, %c10_12] : memref<8x92xbf16, #tpu.memory_space<vmem>>, vector<4x72xbf16>
    %c0_13 = arith.constant 0 : index
    %c11 = arith.constant 11 : index
    %11 = vector.load %arg8[%c0_13, %c11] : memref<8x92xbf16, #tpu.memory_space<vmem>>, vector<4x72xbf16>
    %c0_14 = arith.constant 0 : index
    %c18 = arith.constant 18 : index
    %12 = vector.load %arg8[%c0_14, %c18] : memref<8x92xbf16, #tpu.memory_space<vmem>>, vector<4x72xbf16>
    %c0_15 = arith.constant 0 : index
    %c19 = arith.constant 19 : index
    %13 = vector.load %arg8[%c0_15, %c19] : memref<8x92xbf16, #tpu.memory_space<vmem>>, vector<4x72xbf16>
    %c0_16 = arith.constant 0 : index
    %c20 = arith.constant 20 : index
    %14 = vector.load %arg8[%c0_16, %c20] : memref<8x92xbf16, #tpu.memory_space<vmem>>, vector<4x72xbf16>
    %15 = tpu.concatenate %6, %7, %8, %9, %10, %11, %12, %13, %14 in 0 : vector<4x72xbf16>, vector<4x72xbf16>, vector<4x72xbf16>, vector<4x72xbf16>, vector<4x72xbf16>, vector<4x72xbf16>, vector<4x72xbf16>, vector<4x72xbf16>, vector<4x72xbf16> -> vector<36x72xbf16>
    %c0_17 = arith.constant 0 : index
    %c0_18 = arith.constant 0 : index
    %16 = vector.load %arg2[%c0_17, %c0_18] : memref<8x36xbf16, #tpu.memory_space<vmem>>, vector<8x36xbf16>
    %cst_19 = arith.constant dense<0.000000e+00> : vector<8x72xf32>
    %17 = tpu.matmul %16, %15, %cst_19 {dimension_numbers = #tpu.dot_dimension_numbers<[1], [0], [0], [1], [0, 0, 1, 1], [], []>} : vector<8x36xbf16>, vector<36x72xbf16>, vector<8x72xf32> -> vector<8x72xf32>
    %c0_20 = arith.constant 0 : index
    %c0_21 = arith.constant 0 : index
    %18 = vector.load %arg3[%c0_20, %c0_21] : memref<8x1xf32, #tpu.memory_space<vmem>>, vector<8x1xf32>
    %19 = vector.broadcast %18 : vector<8x1xf32> to vector<8x72xf32>
    %20 = arith.addf %17, %19 : vector<8x72xf32>
    %cst_22 = arith.constant 0.000000e+00 : f32
    %21 = vector.broadcast %cst_22 : f32 to vector<8x72xf32>
    %22 = arith.cmpf oge, %20, %21 : vector<8x72xf32>
    %cst_23 = arith.constant 0.00999999977 : f32
    %23 = vector.broadcast %cst_23 : f32 to vector<8x72xf32>
    %24 = arith.mulf %23, %20 : vector<8x72xf32>
    %25 = arith.select %22, %20, %24 : vector<8x72xi1>, vector<8x72xf32>
    %c0_24 = arith.constant 0 : index
    %c0_25 = arith.constant 0 : index
    %26 = vector.load %arg6[%c0_24, %c0_25] : memref<1x72xf32, #tpu.memory_space<vmem>>, vector<1x72xf32>
    %27 = vector.broadcast %26 : vector<1x72xf32> to vector<8x72xf32>
    %28 = arith.mulf %25, %27 : vector<8x72xf32>
    %29 = arith.truncf %28 : vector<8x72xf32> to vector<8x72xbf16>
    %c0_26 = arith.constant 0 : index
    %c10_27 = arith.constant 10 : index
    %30 = vector.load %arg8[%c0_26, %c10_27] : memref<8x92xbf16, #tpu.memory_space<vmem>>, vector<8x72xbf16>
    tpu.vector_store %arg8[%c0_26, %c10_27], %29 {strides = array<i32>} : memref<8x92xbf16, #tpu.memory_space<vmem>>, vector<8x72xbf16>,
    %c0_28 = arith.constant 0 : index
    %c0_29 = arith.constant 0 : index
    %31 = vector.load %arg8[%c0_28, %c0_29] : memref<8x92xbf16, #tpu.memory_space<vmem>>, vector<8x72xbf16>
    %c0_30 = arith.constant 0 : index
    %c1_31 = arith.constant 1 : index
    %32 = vector.load %arg8[%c0_30, %c1_31] : memref<8x92xbf16, #tpu.memory_space<vmem>>, vector<8x72xbf16>
    %c0_32 = arith.constant 0 : index
    %c2_33 = arith.constant 2 : index
    %33 = vector.load %arg8[%c0_32, %c2_33] : memref<8x92xbf16, #tpu.memory_space<vmem>>, vector<8x72xbf16>
    %c0_34 = arith.constant 0 : index
    %c9_35 = arith.constant 9 : index
    %34 = vector.load %arg8[%c0_34, %c9_35] : memref<8x92xbf16, #tpu.memory_space<vmem>>, vector<8x72xbf16>
    %c0_36 = arith.constant 0 : index
    %c10_37 = arith.constant 10 : index
    %35 = vector.load %arg8[%c0_36, %c10_37] : memref<8x92xbf16, #tpu.memory_space<vmem>>, vector<8x72xbf16>
    %c0_38 = arith.constant 0 : index
    %c11_39 = arith.constant 11 : index
    %36 = vector.load %arg8[%c0_38, %c11_39] : memref<8x92xbf16, #tpu.memory_space<vmem>>, vector<8x72xbf16>
    %c0_40 = arith.constant 0 : index
    %c18_41 = arith.constant 18 : index
    %37 = vector.load %arg8[%c0_40, %c18_41] : memref<8x92xbf16, #tpu.memory_space<vmem>>, vector<8x72xbf16>
    %c0_42 = arith.constant 0 : index
    %c19_43 = arith.constant 19 : index
    %38 = vector.load %arg8[%c0_42, %c19_43] : memref<8x92xbf16, #tpu.memory_space<vmem>>, vector<8x72xbf16>
    %c0_44 = arith.constant 0 : index
    %c20_45 = arith.constant 20 : index
    %39 = vector.load %arg8[%c0_44, %c20_45] : memref<8x92xbf16, #tpu.memory_space<vmem>>, vector<8x72xbf16>
    %40 = tpu.concatenate %31, %32, %33, %34, %35, %36, %37, %38, %39 in 0 : vector<8x72xbf16>, vector<8x72xbf16>, vector<8x72xbf16>, vector<8x72xbf16>, vector<8x72xbf16>, vector<8x72xbf16>, vector<8x72xbf16>, vector<8x72xbf16>, vector<8x72xbf16> -> vector<72x72xbf16>
    %c0_46 = arith.constant 0 : index
    %c0_47 = arith.constant 0 : index
    %41 = vector.load %arg4[%c0_46, %c0_47] : memref<8x72xbf16, #tpu.memory_space<vmem>>, vector<8x72xbf16>
    %cst_48 = arith.constant dense<0.000000e+00> : vector<8x72xf32>
    %42 = tpu.matmul %41, %40, %cst_48 {dimension_numbers = #tpu.dot_dimension_numbers<[1], [0], [0], [1], [0, 0, 1, 1], [], []>} : vector<8x72xbf16>, vector<72x72xbf16>, vector<8x72xf32> -> vector<8x72xf32>
    %c0_49 = arith.constant 0 : index
    %c0_50 = arith.constant 0 : index
    %43 = vector.load %arg5[%c0_49, %c0_50] : memref<8x1xf32, #tpu.memory_space<vmem>>, vector<8x1xf32>
    %44 = vector.broadcast %43 : vector<8x1xf32> to vector<8x72xf32>
    %45 = arith.addf %42, %44 : vector<8x72xf32>
    %cst_51 = arith.constant 0.000000e+00 : f32
    %46 = vector.broadcast %cst_51 : f32 to vector<8x72xf32>
    %47 = arith.cmpf oge, %45, %46 : vector<8x72xf32>
    %cst_52 = arith.constant 0.00999999977 : f32
    %48 = vector.broadcast %cst_52 : f32 to vector<8x72xf32>
    %49 = arith.mulf %48, %45 : vector<8x72xf32>
    %50 = arith.select %47, %45, %49 : vector<8x72xi1>, vector<8x72xf32>
    %51 = arith.truncf %50 : vector<8x72xf32> to vector<8x72xbf16>
    %c0_53 = arith.constant 0 : index
    %c0_54 = arith.constant 0 : index
    %c0_55 = arith.constant 0 : index
    %52 = vector.load %arg7[%c0_53, %c0_54, %c0_55] : memref<1x8x72xbf16, #tpu.memory_space<vmem>>, vector<1x8x72xbf16>
    %53 = vector.shape_cast %52 : vector<1x8x72xbf16> to vector<8x72xbf16>
    %54 = vector.shape_cast %51 : vector<8x72xbf16> to vector<1x8x72xbf16>
    tpu.vector_store %arg7[%c0_53, %c0_54, %c0_55], %54 {strides = array<i32>} : memref<1x8x72xbf16, #tpu.memory_space<vmem>>, vector<1x8x72xbf16>,
    return
  }
  func.func @transform_0(%arg0: i32) -> (i32, i32, i32) {
    %c0_i32 = arith.constant 0 : i32
    %c0_i32_0 = arith.constant 0 : i32
    %c0_i32_1 = arith.constant 0 : i32
    return %arg0, %c0_i32, %c0_i32_0 : i32, i32, i32
  }
  func.func @transform_1(%arg0: i32) -> (i32, i32) {
    %c0_i32 = arith.constant 0 : i32
    %c0_i32_0 = arith.constant 0 : i32
    %c0_i32_1 = arith.constant 0 : i32
    return %c0_i32, %c0_i32_0 : i32, i32
  }
  func.func @transform_2(%arg0: i32) -> (i32, i32) {
    %c0_i32 = arith.constant 0 : i32
    %c0_i32_0 = arith.constant 0 : i32
    %c0_i32_1 = arith.constant 0 : i32
    return %c0_i32, %c0_i32_0 : i32, i32
  }
  func.func @transform_3(%arg0: i32) -> (i32, i32) {
    %c0_i32 = arith.constant 0 : i32
    %c0_i32_0 = arith.constant 0 : i32
    %c0_i32_1 = arith.constant 0 : i32
    return %c0_i32, %c0_i32_0 : i32, i32
  }
  func.func @transform_4(%arg0: i32) -> (i32, i32) {
    %c0_i32 = arith.constant 0 : i32
    %c0_i32_0 = arith.constant 0 : i32
    %c0_i32_1 = arith.constant 0 : i32
    return %c0_i32, %c0_i32_0 : i32, i32
  }
  func.func @transform_5(%arg0: i32) -> (i32, i32) {
    %c0_i32 = arith.constant 0 : i32
    %c0_i32_0 = arith.constant 0 : i32
    %c0_i32_1 = arith.constant 0 : i32
    return %c0_i32, %c0_i32_0 : i32, i32
  }
  func.func @transform_6(%arg0: i32) -> (i32, i32, i32) {
    %c0_i32 = arith.constant 0 : i32
    %c0_i32_0 = arith.constant 0 : i32
    %c0_i32_1 = arith.constant 0 : i32
    return %arg0, %c0_i32, %c0_i32_0 : i32, i32, i32
  }
}

module attributes {stable_mosaic.version = 11 : i64} {
  func.func @_downblock_kernel(%arg0: i32, %arg1: memref<1x4x72xbf16, #tpu.memory_space<vmem>>, %arg2: memref<8x36xbf16, #tpu.memory_space<vmem>>, %arg3: memref<8x1xf32, #tpu.memory_space<vmem>>, %arg4: memref<8x72xbf16, #tpu.memory_space<vmem>>, %arg5: memref<8x1xf32, #tpu.memory_space<vmem>>, %arg6: memref<1x72xf32, #tpu.memory_space<vmem>>, %arg7: memref<1x8x72xbf16, #tpu.memory_space<vmem>>, %arg8: memref<8x92xbf16, #tpu.memory_space<vmem>>) attributes {dimension_semantics = [#tpu.dimension_semantics<parallel>], iteration_bounds = array<i64: 2>, scalar_prefetch = 0 : i64, scratch_operands = 1 : i64, tpu.core_type = #tpu.core_type<tc>, window_params = [{transform_indices = @transform_0, window_bounds = array<i64: 1, 4, 72>}, {pipeline_mode = #tpu.pipeline_mode<synchronous>, transform_indices = @transform_1, window_bounds = array<i64: 8, 36>}, {pipeline_mode = #tpu.pipeline_mode<synchronous>, transform_indices = @transform_2, window_bounds = array<i64: 8, 1>}, {pipeline_mode = #tpu.pipeline_mode<synchronous>, transform_indices = @transform_3, window_bounds = array<i64: 8, 72>}, {pipeline_mode = #tpu.pipeline_mode<synchronous>, transform_indices = @transform_4, window_bounds = array<i64: 8, 1>}, {pipeline_mode = #tpu.pipeline_mode<synchronous>, transform_indices = @transform_5, window_bounds = array<i64: 1, 72>}, {transform_indices = @transform_6, window_bounds = array<i64: 1, 8, 72>}]} {
    %cst = arith.constant 0.000000e+00 : bf16
    %0 = vector.broadcast %cst : bf16 to vector<8x10xbf16>
    %c0 = arith.constant 0 : index
    %c0_0 = arith.constant 0 : index
    %1 = vector.load %arg8[%c0, %c0_0] : memref<8x92xbf16, #tpu.memory_space<vmem>>, vector<8x10xbf16>
    tpu.vector_store %arg8[%c0, %c0_0], %0 {strides = array<i32>} : memref<8x92xbf16, #tpu.memory_space<vmem>>, vector<8x10xbf16>,
    %c0_1 = arith.constant 0 : index
    %c82 = arith.constant 82 : index
    %2 = vector.load %arg8[%c0_1, %c82] : memref<8x92xbf16, #tpu.memory_space<vmem>>, vector<8x10xbf16>
    tpu.vector_store %arg8[%c0_1, %c82], %0 {strides = array<i32>} : memref<8x92xbf16, #tpu.memory_space<vmem>>, vector<8x10xbf16>,
    %c0_2 = arith.constant 0 : index
    %c0_3 = arith.constant 0 : index
    %c0_4 = arith.constant 0 : index
    %3 = vector.load %arg1[%c0_2, %c0_3, %c0_4] : memref<1x4x72xbf16, #tpu.memory_space<vmem>>, vector<1x4x72xbf16>
    %4 = vector.shape_cast %3 : vector<1x4x72xbf16> to vector<4x72xbf16>
    %c0_5 = arith.constant 0 : index
    %c10 = arith.constant 10 : index
    %5 = vector.load %arg8[%c0_5, %c10] : memref<8x92xbf16, #tpu.memory_space<vmem>>, vector<4x72xbf16>
    tpu.vector_store %arg8[%c0_5, %c10], %4 {strides = array<i32>} : memref<8x92xbf16, #tpu.memory_space<vmem>>, vector<4x72xbf16>,
    %c0_6 = arith.constant 0 : index
    %c0_7 = arith.constant 0 : index
    %6 = vector.load %arg8[%c0_6, %c0_7] : memref<8x92xbf16, #tpu.memory_space<vmem>>, vector<4x72xbf16>
    %c0_8 = arith.constant 0 : index
    %c1 = arith.constant 1 : index
    %7 = vector.load %arg8[%c0_8, %c1] : memref<8x92xbf16, #tpu.memory_space<vmem>>, vector<4x72xbf16>
    %c0_9 = arith.constant 0 : index
    %c2 = arith.constant 2 : index
    %8 = vector.load %arg8[%c0_9, %c2] : memref<8x92xbf16, #tpu.memory_space<vmem>>, vector<4x72xbf16>
    %c0_10 = arith.constant 0 : index
    %c9 = arith.constant 9 : index
    %9 = vector.load %arg8[%c0_10, %c9] : memref<8x92xbf16, #tpu.memory_space<vmem>>, vector<4x72xbf16>
    %c0_11 = arith.constant 0 : index
    %c10_12 = arith.constant 10 : index
    %10 = vector.load %arg8[%c0_11, %c10_12] : memref<8x92xbf16, #tpu.memory_space<vmem>>, vector<4x72xbf16>
    %c0_13 = arith.constant 0 : index
    %c11 = arith.constant 11 : index
    %11 = vector.load %arg8[%c0_13, %c11] : memref<8x92xbf16, #tpu.memory_space<vmem>>, vector<4x72xbf16>
    %c0_14 = arith.constant 0 : index
    %c18 = arith.constant 18 : index
    %12 = vector.load %arg8[%c0_14, %c18] : memref<8x92xbf16, #tpu.memory_space<vmem>>, vector<4x72xbf16>
    %c0_15 = arith.constant 0 : index
    %c19 = arith.constant 19 : index
    %13 = vector.load %arg8[%c0_15, %c19] : memref<8x92xbf16, #tpu.memory_space<vmem>>, vector<4x72xbf16>
    %c0_16 = arith.constant 0 : index
    %c20 = arith.constant 20 : index
    %14 = vector.load %arg8[%c0_16, %c20] : memref<8x92xbf16, #tpu.memory_space<vmem>>, vector<4x72xbf16>
    %15 = tpu.concatenate %6, %7, %8, %9, %10, %11, %12, %13, %14 in 0 : vector<4x72xbf16>, vector<4x72xbf16>, vector<4x72xbf16>, vector<4x72xbf16>, vector<4x72xbf16>, vector<4x72xbf16>, vector<4x72xbf16>, vector<4x72xbf16>, vector<4x72xbf16> -> vector<36x72xbf16>
    %c0_17 = arith.constant 0 : index
    %c0_18 = arith.constant 0 : index
    %16 = vector.load %arg2[%c0_17, %c0_18] : memref<8x36xbf16, #tpu.memory_space<vmem>>, vector<8x36xbf16>
    %cst_19 = arith.constant dense<0.000000e+00> : vector<8x72xf32>
    %17 = tpu.matmul %16, %15, %cst_19 {dimension_numbers = #tpu.dot_dimension_numbers<[1], [0], [0], [1], [0, 0, 1, 1], [], []>} : vector<8x36xbf16>, vector<36x72xbf16>, vector<8x72xf32> -> vector<8x72xf32>
    %c0_20 = arith.constant 0 : index
    %c0_21 = arith.constant 0 : index
    %18 = vector.load %arg3[%c0_20, %c0_21] : memref<8x1xf32, #tpu.memory_space<vmem>>, vector<8x1xf32>
    %19 = vector.broadcast %18 : vector<8x1xf32> to vector<8x72xf32>
    %20 = arith.addf %17, %19 : vector<8x72xf32>
    %cst_22 = arith.constant 0.000000e+00 : f32
    %21 = vector.broadcast %cst_22 : f32 to vector<8x72xf32>
    %22 = arith.cmpf oge, %20, %21 : vector<8x72xf32>
    %cst_23 = arith.constant 0.00999999977 : f32
    %23 = vector.broadcast %cst_23 : f32 to vector<8x72xf32>
    %24 = arith.mulf %23, %20 : vector<8x72xf32>
    %25 = arith.select %22, %20, %24 : vector<8x72xi1>, vector<8x72xf32>
    %c0_24 = arith.constant 0 : index
    %c0_25 = arith.constant 0 : index
    %26 = vector.load %arg6[%c0_24, %c0_25] : memref<1x72xf32, #tpu.memory_space<vmem>>, vector<1x72xf32>
    %27 = vector.broadcast %26 : vector<1x72xf32> to vector<8x72xf32>
    %28 = arith.mulf %25, %27 : vector<8x72xf32>
    %29 = arith.truncf %28 : vector<8x72xf32> to vector<8x72xbf16>
    %c0_26 = arith.constant 0 : index
    %c10_27 = arith.constant 10 : index
    %30 = vector.load %arg8[%c0_26, %c10_27] : memref<8x92xbf16, #tpu.memory_space<vmem>>, vector<8x72xbf16>
    tpu.vector_store %arg8[%c0_26, %c10_27], %29 {strides = array<i32>} : memref<8x92xbf16, #tpu.memory_space<vmem>>, vector<8x72xbf16>,
    %c0_28 = arith.constant 0 : index
    %c0_29 = arith.constant 0 : index
    %31 = vector.load %arg8[%c0_28, %c0_29] : memref<8x92xbf16, #tpu.memory_space<vmem>>, vector<8x72xbf16>
    %c0_30 = arith.constant 0 : index
    %c1_31 = arith.constant 1 : index
    %32 = vector.load %arg8[%c0_30, %c1_31] : memref<8x92xbf16, #tpu.memory_space<vmem>>, vector<8x72xbf16>
    %c0_32 = arith.constant 0 : index
    %c2_33 = arith.constant 2 : index
    %33 = vector.load %arg8[%c0_32, %c2_33] : memref<8x92xbf16, #tpu.memory_space<vmem>>, vector<8x72xbf16>
    %c0_34 = arith.constant 0 : index
    %c9_35 = arith.constant 9 : index
    %34 = vector.load %arg8[%c0_34, %c9_35] : memref<8x92xbf16, #tpu.memory_space<vmem>>, vector<8x72xbf16>
    %c0_36 = arith.constant 0 : index
    %c10_37 = arith.constant 10 : index
    %35 = vector.load %arg8[%c0_36, %c10_37] : memref<8x92xbf16, #tpu.memory_space<vmem>>, vector<8x72xbf16>
    %c0_38 = arith.constant 0 : index
    %c11_39 = arith.constant 11 : index
    %36 = vector.load %arg8[%c0_38, %c11_39] : memref<8x92xbf16, #tpu.memory_space<vmem>>, vector<8x72xbf16>
    %c0_40 = arith.constant 0 : index
    %c18_41 = arith.constant 18 : index
    %37 = vector.load %arg8[%c0_40, %c18_41] : memref<8x92xbf16, #tpu.memory_space<vmem>>, vector<8x72xbf16>
    %c0_42 = arith.constant 0 : index
    %c19_43 = arith.constant 19 : index
    %38 = vector.load %arg8[%c0_42, %c19_43] : memref<8x92xbf16, #tpu.memory_space<vmem>>, vector<8x72xbf16>
    %c0_44 = arith.constant 0 : index
    %c20_45 = arith.constant 20 : index
    %39 = vector.load %arg8[%c0_44, %c20_45] : memref<8x92xbf16, #tpu.memory_space<vmem>>, vector<8x72xbf16>
    %40 = tpu.concatenate %31, %32, %33, %34, %35, %36, %37, %38, %39 in 0 : vector<8x72xbf16>, vector<8x72xbf16>, vector<8x72xbf16>, vector<8x72xbf16>, vector<8x72xbf16>, vector<8x72xbf16>, vector<8x72xbf16>, vector<8x72xbf16>, vector<8x72xbf16> -> vector<72x72xbf16>
    %c0_46 = arith.constant 0 : index
    %c0_47 = arith.constant 0 : index
    %41 = vector.load %arg4[%c0_46, %c0_47] : memref<8x72xbf16, #tpu.memory_space<vmem>>, vector<8x72xbf16>
    %cst_48 = arith.constant dense<0.000000e+00> : vector<8x72xf32>
    %42 = tpu.matmul %41, %40, %cst_48 {dimension_numbers = #tpu.dot_dimension_numbers<[1], [0], [0], [1], [0, 0, 1, 1], [], []>} : vector<8x72xbf16>, vector<72x72xbf16>, vector<8x72xf32> -> vector<8x72xf32>
    %c0_49 = arith.constant 0 : index
    %c0_50 = arith.constant 0 : index
    %43 = vector.load %arg5[%c0_49, %c0_50] : memref<8x1xf32, #tpu.memory_space<vmem>>, vector<8x1xf32>
    %44 = vector.broadcast %43 : vector<8x1xf32> to vector<8x72xf32>
    %45 = arith.addf %42, %44 : vector<8x72xf32>
    %cst_51 = arith.constant 0.000000e+00 : f32
    %46 = vector.broadcast %cst_51 : f32 to vector<8x72xf32>
    %47 = arith.cmpf oge, %45, %46 : vector<8x72xf32>
    %cst_52 = arith.constant 0.00999999977 : f32
    %48 = vector.broadcast %cst_52 : f32 to vector<8x72xf32>
    %49 = arith.mulf %48, %45 : vector<8x72xf32>
    %50 = arith.select %47, %45, %49 : vector<8x72xi1>, vector<8x72xf32>
    %51 = arith.truncf %50 : vector<8x72xf32> to vector<8x72xbf16>
    %c0_53 = arith.constant 0 : index
    %c0_54 = arith.constant 0 : index
    %c0_55 = arith.constant 0 : index
    %52 = vector.load %arg7[%c0_53, %c0_54, %c0_55] : memref<1x8x72xbf16, #tpu.memory_space<vmem>>, vector<1x8x72xbf16>
    %53 = vector.shape_cast %52 : vector<1x8x72xbf16> to vector<8x72xbf16>
    %54 = vector.shape_cast %51 : vector<8x72xbf16> to vector<1x8x72xbf16>
    tpu.vector_store %arg7[%c0_53, %c0_54, %c0_55], %54 {strides = array<i32>} : memref<1x8x72xbf16, #tpu.memory_space<vmem>>, vector<1x8x72xbf16>,
    return
  }
  func.func @transform_0(%arg0: i32) -> (i32, i32, i32) {
    %c0_i32 = arith.constant 0 : i32
    %c0_i32_0 = arith.constant 0 : i32
    %c0_i32_1 = arith.constant 0 : i32
    return %arg0, %c0_i32, %c0_i32_0 : i32, i32, i32
  }
  func.func @transform_1(%arg0: i32) -> (i32, i32) {
    %c0_i32 = arith.constant 0 : i32
    %c0_i32_0 = arith.constant 0 : i32
    %c0_i32_1 = arith.constant 0 : i32
    return %c0_i32, %c0_i32_0 : i32, i32
  }
  func.func @transform_2(%arg0: i32) -> (i32, i32) {
    %c0_i32 = arith.constant 0 : i32
    %c0_i32_0 = arith.constant 0 : i32
    %c0_i32_1 = arith.constant 0 : i32
    return %c0_i32, %c0_i32_0 : i32, i32
  }
  func.func @transform_3(%arg0: i32) -> (i32, i32) {
    %c0_i32 = arith.constant 0 : i32
    %c0_i32_0 = arith.constant 0 : i32
    %c0_i32_1 = arith.constant 0 : i32
    return %c0_i32, %c0_i32_0 : i32, i32
  }
  func.func @transform_4(%arg0: i32) -> (i32, i32) {
    %c0_i32 = arith.constant 0 : i32
    %c0_i32_0 = arith.constant 0 : i32
    %c0_i32_1 = arith.constant 0 : i32
    return %c0_i32, %c0_i32_0 : i32, i32
  }
  func.func @transform_5(%arg0: i32) -> (i32, i32) {
    %c0_i32 = arith.constant 0 : i32
    %c0_i32_0 = arith.constant 0 : i32
    %c0_i32_1 = arith.constant 0 : i32
    return %c0_i32, %c0_i32_0 : i32, i32
  }
  func.func @transform_6(%arg0: i32) -> (i32, i32, i32) {
    %c0_i32 = arith.constant 0 : i32
    %c0_i32_0 = arith.constant 0 : i32
    %c0_i32_1 = arith.constant 0 : i32
    return %arg0, %c0_i32, %c0_i32_0 : i32, i32, i32
  }
}

</mosaic_0001>

<bundles_post_ra>
// kernel: tpu_custom_call.1
= control target key start
LH: loop header
LB: loop body
LE: loop exit
PB: predicated region body
PF: predicated region fallthrough
CT: control target
= control target key end

     0   :  { %11 = vsyncpa [#allocation4], 0  ;;  %s922_s0 = inlined_call_operand.vmem [shape: bf16[2,4,72], index: 0, kind: input, shape index: {}]   ;;  %s923_s1 = inlined_call_operand.vmem [shape: bf16[8,36], index: 1, kind: input, shape index: {}]   ;;  %s924_s2 = inlined_call_operand.vmem [shape: f32[8,1], index: 2, kind: input, shape index: {}]   ;;  %s925_s3 = inlined_call_operand.vmem [shape: bf16[8,72], index: 3, kind: input, shape index: {}]   ;;  %s926_s4 = inlined_call_operand.vmem [shape: f32[8,1], index: 4, kind: input, shape index: {}]   ;;  %s927_s5 = inlined_call_operand.vmem [shape: f32[1,72], index: 5, kind: input, shape index: {}]   ;;  %s928_s6 = inlined_call_operand.hbm [shape: bf16[2,8,72], index: 6, kind: output, shape index: {}]  }
   0x1   :  { %13 = vsyncpa [#allocation4 + $0x1], 0  ;;  %s769_s21 = smov 0   ;;  %s771_s22 = smov 0  }
   0x2   :  { %s773_s23 = smov 0   ;;  %s775_s24 = smov 0  }
   0x3 LB: > { %s790_s25 = sadd.s32 4294967295, %s719_s24   ;;  %s550_s26 = sadd.s32 4294967294, %s719_s24   ;;  %s719_s24 = sphi %s775_s24, %s934_s24   ;;  %s715_s23 = sphi %s773_s23, %s933_s23   ;;  %s711_s22 = sphi %s771_s22, %s932_s22   ;;  %s707_s21 = sphi %s769_s21, %s931_s21  }
   0x4   : > { %s794_s27 = sadd.s32 1, %s719_s24   ;;  %s157_s28 = sadd.s32 1, %s715_s23 }
   0x5   : > { %s154_s29 = ssub.s32 %s719_s24, %s794_s27  ;;  %p167_p0 = scmp.ne.s32.totalorder %s715_s23, %s711_s22 }
   0x6   : > { %p155_p1 = scmp.eq.s32.totalorder %s154_s29, 0  ;;  %p168_p2 = scmp.eq.s32.totalorder %s790_s25, 1 }
   0x7   : > { %p173_p3 = scmp.ne.s32.totalorder %s711_s22, %s707_s21  ;;  %p174_p4 = scmp.eq.s32.totalorder %s550_s26, 1 }
   0x8   : > { %s805_s30 = scalar_select %p155_p1, %s715_s23, %s157_s28  }
   0x9   : > { %p807_p5 = por %p168_p2, %p167_p0  ;;  %p811_p6 = por %p174_p4, %p173_p3 }
   0xa   : > { %p553_p7 = scmp.ge.s32.totalorder %s719_s24, 1  ;;  %p214_p8 = scmp.lt.s32.totalorder %s719_s24, 3 }
   0xc   : > { %p215_p9 = pnand %p553_p7, %p214_p8 }
   0xd   : > { %p243_p10 = scmp.lt.s32.totalorder (!%p215_p9), %s790_s25, 1  ;;  %vm248_vm0 = vcmask (!%p215_p9), 76800   ;;  %vm250_vm1 = vcmask (!%p215_p9), 749200   ;;  %v721_v0 = vmov (!%p215_p9), 0   ;;  %s722_s14 = smov (!%p215_p9), 10   ;;  %vm264_vm2 = vcmask (!%p215_p9), 664656  }
   0xe   : > { %218 = sbr.rel (%p215_p9) target bundleno = 1000 (0x3e8), region = 44  ;;  %249 = vst.msk [vmem:[#allocation2] sm:$0xf] (!%p215_p9), %vm248_vm0, %v721_v0  ;;  %653 = vset.pattern.permute.xlu1 (!%p215_p9), %v721_v0  ;;  %654 = vset.pattern.permute.xlu0 (!%p215_p9), %v721_v0  ;;  %v723_v3 = vmov (!%p215_p9), 0.0   ;;  %s724_s15 = smov (!%p215_p9), 126   ;;  %vm727_vm3 = vmmov (!%p215_p9), 0  }
   0xf   : > { %251 = vst.msk [vmem:[#allocation2] sm:$0xf] (!%p215_p9), %vm250_vm1, %v721_v0  ;;  %578 = vmatprep.subr.bf16.mxu0 (!%p215_p9), %v723_v3  ;;  %588 = vmatprep.subr.bf16.mxu1 (!%p215_p9), %v723_v3  ;;  %s725_s16 = smov (!%p215_p9), 127   ;;  %s726_s17 = smov (!%p215_p9), 119   ;;  %v308_v8 = vld [vmem:[%s924_s2] sm:$0xff] (!%p215_p9)  ;;  %vm288_vm4 = vcmask (!%p215_p9), 1041408  }
  0x10   : > { %584 = vmatprep.mubr.msk.bf16.mxu0 (!%p215_p9), %vm727_vm3, %v723_v3  ;;  %598 = vmatprep.mubr.msk.bf16.mxu1 (!%p215_p9), %vm727_vm3, %v723_v3  ;;  %s728_s18 = smov (!%p215_p9), 118   ;;  %s729_s19 = smov (!%p215_p9), 117   ;;  %vm292_vm5 = vcmask (!%p215_p9), 1043456   ;;  %vm295_vm6 = vcmask (!%p215_p9), 1045504   ;;  %v307_v24 = vld [vmem:[%s923_s1] sm:$0xf] (!%p215_p9) }
  0x11   : > { %s730_s20 = smov (!%p215_p9), 110   ;;  %s731_s26 = smov (!%p215_p9), 109   ;;  %vm314_vm7 = vcmask (!%p215_p9), 293888   ;;  %v559_v32 = vld [vmem:[%s927_s5] ss:$0 sm:$0xff] (!%p215_p9)  ;;  %vm379_vm9 = vcmask (!%p215_p9), 666704  }
  0x12   : > { %v418_v39 = vld [vmem:[%s926_s4] sm:$0xff] (!%p215_p9)  ;;  %vm424_vm10 = vcmask (!%p215_p9), 588800   ;;  %vm475_vm12 = vcmask (!%p215_p9), 584704  }
  0x13   : > { %v417_v53 = vld [vmem:[%s925_s3] sm:$0xf] (!%p215_p9) }
  0x15   : > { %s244_s9 = scalar_select %p243_p10, %s790_s25, 1 }
  0x17   : > { %s555_s10 = sshll.u32 %s244_s9, 1  ;;  %s732_s9 = smov 108  }
  0x18   : > { %s246_s13 = scalar_lea.vmem %s922_s0, %s555_s10 }
  0x19   : > { %v556_v1 = vld.sshfl [vmem:[%s246_s13] sm:$0x3 pattern:$0x76325410] }
  0x1a   : > { %261 = vrot.lane.b32.xlu0 %v556_v1, %s722_s14 }
  0x8c   : > { %v262_v2 = vpop.permute.xlu0 %261 }
  0x8d   : > { %265 = vst.msk [vmem:[#allocation2] sm:$0x3] %vm264_vm2, %v262_v2 }
  0x94   : > { %v266_v4 = vld [vmem:[#allocation2] sm:$0x3] }
  0x95   : > { %v557_v5 = vcombine.low %v266_v4, %v266_v4 }
  0x97   : > { %273 = vrot.lane.b32.xlu1 %v557_v5, %s724_s15  ;;  %v270_v6 = vrot.slane %v557_v5, 6  ;;  %v275_v7 = vrot.slane %v557_v5, 2 }
  0x99   : > { %271 = vrot.lane.b32.xlu0 %v270_v6, %s725_s16 }
  0x9b   : > { %276 = vrot.lane.b32.xlu1 %v275_v7, %s726_s17 }
  0x9d   : > { %278 = vrot.lane.b32.xlu0 %v557_v5, %s728_s18 }
  0x9f   : > { %280 = vrot.lane.b32.xlu1 %v270_v6, %s729_s19 }
  0xa1   : > { %282 = vrot.lane.b32.xlu0 %v557_v5, %s730_s20 }
  0xa3   : > { %284 = vrot.lane.b32.xlu1 %v275_v7, %s731_s26 }
  0xa5   : > { %286 = vrot.lane.b32.xlu0 %v557_v5, %s732_s9 }
  0xa7   : > { %311 = vperm.xlu1 %653, %v308_v8  }
 0x109   : > { %v274_v9 = vpop.permute.xlu1 %273 }
 0x10b   : > { %v272_v10 = vpop.permute.xlu0 %271 }
 0x10c   : > { %v291_v11 = vsel %vm288_vm4, %v266_v4, %v272_v10 }
 0x10d   : > { %v277_v12 = vpop.permute.xlu1 %276  ;;  %v294_v13 = vsel %vm292_vm5, %v291_v11, %v274_v9 }
 0x10e   : > { %v297_v14 = vsel %vm295_vm6, %v294_v13, %v277_v12 }
 0x10f   : > { %579 = vmatpush3.bf16.msra.mxu0 %v297_v14  ;;  %v279_v15 = vpop.permute.xlu0 %278 }
 0x110   : > { %580 = vmatprep.subr.bf16.mxu0 %v723_v3 }
 0x111   : > { %v281_v16 = vpop.permute.xlu1 %280 }
 0x112   : > { %v301_v17 = vsel %vm288_vm4, %v279_v15, %v281_v16 }
 0x113   : > { %v283_v18 = vpop.permute.xlu0 %282 }
 0x114   : > { %v303_v19 = vsel %vm292_vm5, %v301_v17, %v283_v18 }
 0x115   : > { %v285_v20 = vpop.permute.xlu1 %284 }
 0x116   : > { %v305_v21 = vsel %vm295_vm6, %v303_v19, %v285_v20 }
 0x117   : > { %581 = vmatpush3.bf16.msra.mxu0 %v305_v21  ;;  %v287_v22 = vpop.permute.xlu0 %286 }
 0x118   : > { %582 = vmatprep.subr.bf16.mxu0 %v723_v3  ;;  %v319_v23 = vsel %vm288_vm4, %v287_v22, 0 }
 0x11b   : > { %583 = vmatpush3.bf16.msra.mxu0 %v319_v23 }
 0x11e   : > { %585 = vmatmul.mubr.msk.bf16.vlgmr.msra.gmra.mrb[0].mxu0 %vm314_vm7, %v307_v24 }
 0x126   : > { %v312_v25 = vpop.permute.xlu1 %311 }
 0x1f1   : > { %v355_v26 = vpop.f32.mrb[0].mxu0 }
 0x1f2   : > { %v356_v27 = vadd.f32 %v355_v26, %v312_v25  ;;  %v586_v28 = vpop.f32.mrb[1].mxu0 }
 0x1f3   : > { %v358_v29 = vpop.f32.mrb[2].mxu0 }
 0x1f4   : > { %vm361_vm8 = vcmp.ge.f32.partialorder %v356_v27, 0.0  ;;  %v362_v30 = vmul.f32 0.01, %v356_v27  ;;  %v587_v31 = vpop.f32.mrb[3].mxu0 }
 0x1f6   : > { %v363_v33 = vsel %vm361_vm8, %v356_v27, %v362_v30 }
 0x1f7   : > { %v371_v34 = vmul.f32 %v559_v32, %v363_v33 }
 0x1f9   : > { %v567_v35 = vpack.c.bf16 %v371_v34, %v371_v34 }
 0x1fb   : > { %376 = vrot.lane.b32.xlu0 %v567_v35, %s722_s14 }
 0x26d   : > { %v377_v36 = vpop.permute.xlu0 %376 }
 0x26e   : > { %380 = vst.msk [vmem:[#allocation2] sm:$0xf] %vm379_vm9, %v377_v36 }
 0x275   : > { %v381_v37 = vld [vmem:[#allocation2] sm:$0xf] }
 0x276   : > { %v561_v38 = vcombine.low %v381_v37, %v381_v37 }
 0x278   : > { %387 = vrot.lane.b32.xlu0 %v561_v38, %s724_s15  ;;  %385 = vrot.lane.b32.xlu1 %v561_v38, %s725_s16 }
 0x27c   : > { %391 = vrot.lane.b32.xlu0 %v561_v38, %s728_s18  ;;  %389 = vrot.lane.b32.xlu1 %v561_v38, %s726_s17  ;;  %s240_s17 = sand.u32 1, %s711_s22  }
 0x27d   : > { %s554_s18 = sshll.u32 %s240_s17, 2  ;;  %s478_s11 = scalar_lea.sflag [#allocation4], %s240_s17 }
 0x280   : > { %395 = vrot.lane.b32.xlu0 %v561_v38, %s730_s20  ;;  %393 = vrot.lane.b32.xlu1 %v561_v38, %s729_s19  ;;  %s564_s19 = sshll.u32 %s790_s25, 6  ;;  %s242_s20 = scalar_lea.vmem [#allocation3], %s554_s18 }
 0x281   : > { %s880_s10 = scalar_lea.hbm %s928_s6, %s564_s19  ;;  %s733_s25 = smov [#allocation3]  }
 0x282   : > { %s661_s13 = sshll.u32 %s733_s25, 4  ;;  %s662_s13 = int_to_ptr.vmem [resolvable:$false] %s661_s13 }
 0x283   : > { %s663_s14 = scalar_lea.vmem %s662_s13, 128 }
 0x284   : > { %399 = vrot.lane.b32.xlu0 %v561_v38, %s732_s9  ;;  %397 = vrot.lane.b32.xlu1 %v561_v38, %s731_s26  ;;  %s491_s26 = sshll.u32 %s242_s20, 4  ;;  %s882_s26 = int_to_ptr.vmem [resolvable:$true] %s491_s26 }
 0x285   : > { %s657_s12 = scalar_lea.vmem %s882_s26, 64  ;;  %p664_p0 = scmp.lt.s32.totalorder %s882_s26, %s662_s13 }
 0x286   : > { %p658_p11 = scmp.ne.s32.totalorder %s882_s26, %s657_s12  ;;  %p665_p1 = scmp.lt.s32.totalorder %s663_s14, %s657_s12 }
 0x288   : > { %421 = vperm.xlu1 %653, %v418_v39   ;;  %p659_p12 = pnand %p658_p11, %p807_p5  ;;  %p666_p2 = por %p665_p1, %p664_p0 }
 0x28a   : > { %p660_p13 = pneg %p659_p12 }
 0x28c   : > { %p667_p3 = pnand %p666_p2, %p660_p13 }
 0x2ea   : > { %v388_v40 = vpop.permute.xlu0 %387  ;;  %v386_v41 = vpop.permute.xlu1 %385 }
 0x2eb   : > { %v403_v42 = vsel %vm292_vm5, %v381_v37, %v386_v41 }
 0x2ec   : > { %589 = vmatpush3.bf16.msra.mxu1 %v403_v42 }
 0x2ed   : > { %590 = vmatprep.subr.bf16.mxu1 %v723_v3 }
 0x2ee   : > { %v392_v43 = vpop.permute.xlu0 %391  ;;  %v390_v44 = vpop.permute.xlu1 %389 }
 0x2ef   : > { %v407_v45 = vsel %vm292_vm5, %v388_v40, %v390_v44 }
 0x2f0   : > { %591 = vmatpush3.bf16.msra.mxu1 %v407_v45 }
 0x2f1   : > { %592 = vmatprep.subr.bf16.mxu1 %v723_v3 }
 0x2f2   : > { %v396_v46 = vpop.permute.xlu0 %395  ;;  %v394_v47 = vpop.permute.xlu1 %393 }
 0x2f3   : > { %v411_v48 = vsel %vm292_vm5, %v392_v43, %v394_v47 }
 0x2f4   : > { %593 = vmatpush3.bf16.msra.mxu1 %v411_v48 }
 0x2f5   : > { %594 = vmatprep.subr.bf16.mxu1 %v723_v3 }
 0x2f6   : > { %v398_v49 = vpop.permute.xlu1 %397  ;;  %v400_v51 = vpop.permute.xlu0 %399 }
 0x2f7   : > { %v415_v50 = vsel %vm292_vm5, %v396_v46, %v398_v49  ;;  %v429_v52 = vsel %vm292_vm5, %v400_v51, 0 }
 0x2f8   : > { %595 = vmatpush3.bf16.msra.mxu1 %v415_v50 }
 0x2f9   : > { %596 = vmatprep.subr.bf16.mxu1 %v723_v3 }
 0x2fc   : > { %597 = vmatpush3.bf16.msra.mxu1 %v429_v52 }
 0x2ff   : > { %599 = vmatmul.mubr.msk.bf16.vlgmr.msra.gmra.mrb[0].mxu1 %vm424_vm10, %v417_v53 }
 0x307   : > { %v422_v54 = vpop.permute.xlu1 %421 }
 0x3d2   : > { %v465_v55 = vpop.f32.mrb[0].mxu1 }
 0x3d3   : > { %v466_v56 = vadd.f32 %v465_v55, %v422_v54  ;;  %v600_v57 = vpop.f32.mrb[1].mxu1 }
 0x3d4   : > { %v468_v58 = vpop.f32.mrb[2].mxu1 }
 0x3d5   : > { %vm471_vm11 = vcmp.ge.f32.partialorder %v466_v56, 0.0  ;;  %v472_v59 = vmul.f32 0.01, %v466_v56  ;;  %v601_v60 = vpop.f32.mrb[3].mxu1 }
 0x3d7   : > { %v473_v61 = vsel %vm471_vm11, %v466_v56, %v472_v59 }
 0x3d8   : > { %v474_v62 = vpack.c.bf16 %v473_v61, %v473_v61 }
 0x3da   : > { %476 = vst.msk [vmem:[%s242_s20] sm:$0xf] %vm475_vm12, %v474_v62 }
 0x3db   : > { %670 = shalt.err (!%p667_p3)
}
 0x3dc   : > { %s671_s28 = scalar_lea.hbm %s880_s10, 64  ;;  %s675_s17 = scalar_lea.hbm %s928_s6, 128 }
 0x3dd   : > { %p672_p4 = scmp.ne.s32.totalorder %s880_s10, %s671_s28  ;;  %p676_p9 = scmp.lt.u32.totalorder %s880_s10, %s928_s6 }
 0x3de   : > { %p677_p10 = scmp.lt.u32.totalorder %s675_s17, %s671_s28  ;;  %p679_p12 = scmp.lt.u32.totalorder %s671_s28, %s880_s10 }
 0x3df   : > { %p673_p7 = pnand %p672_p4, %p807_p5 }
 0x3e0   : > { %p678_p11 = por %p677_p10, %p676_p9 }
 0x3e1   : > { %p674_p8 = pneg %p673_p7 }
 0x3e2   : > { %p680_p13 = por %p679_p12, %p678_p11 }
 0x3e4   : > { %p681_p0 = pnand %p680_p13, %p674_p8 }
 0x3e6   : > { %684 = shalt.err (!%p681_p0)
}
 0x3e7   : > { %602 = dma.vmem_to_hbm [thread:$0]  (%p807_p5), %s882_s26, 64, %s880_s10, %s478_s11  }
 0x3e8 PF: > { %p608_p1 = scmp.ge.s32.totalorder %s719_s24, 2  ;;  %s503_s20 = sand.u32 1, %s707_s21  }
 0x3e9   : > { %s504_s29 = scalar_lea.sflag [#allocation4], %s503_s20 }
 0x3ea   : > { %p605_p2 = pnand %p608_p1, %p811_p6 }
 0x3ec   : > { %702 = dma.done.wait (!%p605_p2), %s504_s29, 64  }
 0x3ed   : > { %704 = vsyncadd (!%p605_p2), %s504_s29, 4294967232  ;;  %p16_p3 = scmp.ge.s32.totalorder %s794_s27, 4   ;;  %s931_s21 = smov %s711_s22 }
 0x3ee   : > { %s932_s22 = smov %s715_s23  ;;  %s933_s23 = smov %s805_s30 }
 0x3ef   : > { %s934_s24 = smov %s794_s27  ;;  %18 = sbr.rel (!%p16_p3) target bundleno = 3 (0x3), region = 79 }
 0x3f6   :  { %509 = vsyncpa [#allocation4], 1 }
 0x3f7   :  { %511 = vsyncpa [#allocation4 + $0x1], 1 }

// kernel: tpu_custom_call.1
= control target key start
LH: loop header
LB: loop body
LE: loop exit
PB: predicated region body
PF: predicated region fallthrough
CT: control target
= control target key end

     0   :  { %11 = vsyncpa [#allocation4], 0  ;;  %s922_s0 = inlined_call_operand.vmem [shape: bf16[2,4,72], index: 0, kind: input, shape index: {}]   ;;  %s923_s1 = inlined_call_operand.vmem [shape: bf16[8,36], index: 1, kind: input, shape index: {}]   ;;  %s924_s2 = inlined_call_operand.vmem [shape: f32[8,1], index: 2, kind: input, shape index: {}]   ;;  %s925_s3 = inlined_call_operand.vmem [shape: bf16[8,72], index: 3, kind: input, shape index: {}]   ;;  %s926_s4 = inlined_call_operand.vmem [shape: f32[8,1], index: 4, kind: input, shape index: {}]   ;;  %s927_s5 = inlined_call_operand.vmem [shape: f32[1,72], index: 5, kind: input, shape index: {}]   ;;  %s928_s6 = inlined_call_operand.hbm [shape: bf16[2,8,72], index: 6, kind: output, shape index: {}]  }
   0x1   :  { %13 = vsyncpa [#allocation4 + $0x1], 0  ;;  %s769_s21 = smov 0   ;;  %s771_s22 = smov 0  }
   0x2   :  { %s773_s23 = smov 0   ;;  %s775_s24 = smov 0  }
   0x3 LB: > { %s790_s25 = sadd.s32 4294967295, %s719_s24   ;;  %s550_s26 = sadd.s32 4294967294, %s719_s24   ;;  %s719_s24 = sphi %s775_s24, %s934_s24   ;;  %s715_s23 = sphi %s773_s23, %s933_s23   ;;  %s711_s22 = sphi %s771_s22, %s932_s22   ;;  %s707_s21 = sphi %s769_s21, %s931_s21  }
   0x4   : > { %s794_s27 = sadd.s32 1, %s719_s24   ;;  %s157_s28 = sadd.s32 1, %s715_s23 }
   0x5   : > { %s154_s29 = ssub.s32 %s719_s24, %s794_s27  ;;  %p167_p0 = scmp.ne.s32.totalorder %s715_s23, %s711_s22 }
   0x6   : > { %p155_p1 = scmp.eq.s32.totalorder %s154_s29, 0  ;;  %p168_p2 = scmp.eq.s32.totalorder %s790_s25, 1 }
   0x7   : > { %p173_p3 = scmp.ne.s32.totalorder %s711_s22, %s707_s21  ;;  %p174_p4 = scmp.eq.s32.totalorder %s550_s26, 1 }
   0x8   : > { %s805_s30 = scalar_select %p155_p1, %s715_s23, %s157_s28  }
   0x9   : > { %p807_p5 = por %p168_p2, %p167_p0  ;;  %p811_p6 = por %p174_p4, %p173_p3 }
   0xa   : > { %p553_p7 = scmp.ge.s32.totalorder %s719_s24, 1  ;;  %p214_p8 = scmp.lt.s32.totalorder %s719_s24, 3 }
   0xc   : > { %p215_p9 = pnand %p553_p7, %p214_p8 }
   0xd   : > { %p243_p10 = scmp.lt.s32.totalorder (!%p215_p9), %s790_s25, 1  ;;  %vm248_vm0 = vcmask (!%p215_p9), 76800   ;;  %vm250_vm1 = vcmask (!%p215_p9), 749200   ;;  %v721_v0 = vmov (!%p215_p9), 0   ;;  %s722_s14 = smov (!%p215_p9), 10   ;;  %vm264_vm2 = vcmask (!%p215_p9), 664656  }
   0xe   : > { %218 = sbr.rel (%p215_p9) target bundleno = 1000 (0x3e8), region = 44  ;;  %249 = vst.msk [vmem:[#allocation2] sm:$0xf] (!%p215_p9), %vm248_vm0, %v721_v0  ;;  %653 = vset.pattern.permute.xlu1 (!%p215_p9), %v721_v0  ;;  %654 = vset.pattern.permute.xlu0 (!%p215_p9), %v721_v0  ;;  %v723_v3 = vmov (!%p215_p9), 0.0   ;;  %s724_s15 = smov (!%p215_p9), 126   ;;  %vm727_vm3 = vmmov (!%p215_p9), 0  }
   0xf   : > { %251 = vst.msk [vmem:[#allocation2] sm:$0xf] (!%p215_p9), %vm250_vm1, %v721_v0  ;;  %578 = vmatprep.subr.bf16.mxu0 (!%p215_p9), %v723_v3  ;;  %588 = vmatprep.subr.bf16.mxu1 (!%p215_p9), %v723_v3  ;;  %s725_s16 = smov (!%p215_p9), 127   ;;  %s726_s17 = smov (!%p215_p9), 119   ;;  %v308_v8 = vld [vmem:[%s924_s2] sm:$0xff] (!%p215_p9)  ;;  %vm288_vm4 = vcmask (!%p215_p9), 1041408  }
  0x10   : > { %584 = vmatprep.mubr.msk.bf16.mxu0 (!%p215_p9), %vm727_vm3, %v723_v3  ;;  %598 = vmatprep.mubr.msk.bf16.mxu1 (!%p215_p9), %vm727_vm3, %v723_v3  ;;  %s728_s18 = smov (!%p215_p9), 118   ;;  %s729_s19 = smov (!%p215_p9), 117   ;;  %vm292_vm5 = vcmask (!%p215_p9), 1043456   ;;  %vm295_vm6 = vcmask (!%p215_p9), 1045504   ;;  %v307_v24 = vld [vmem:[%s923_s1] sm:$0xf] (!%p215_p9) }
  0x11   : > { %s730_s20 = smov (!%p215_p9), 110   ;;  %s731_s26 = smov (!%p215_p9), 109   ;;  %vm314_vm7 = vcmask (!%p215_p9), 293888   ;;  %v559_v32 = vld [vmem:[%s927_s5] ss:$0 sm:$0xff] (!%p215_p9)  ;;  %vm379_vm9 = vcmask (!%p215_p9), 666704  }
  0x12   : > { %v418_v39 = vld [vmem:[%s926_s4] sm:$0xff] (!%p215_p9)  ;;  %vm424_vm10 = vcmask (!%p215_p9), 588800   ;;  %vm475_vm12 = vcmask (!%p215_p9), 584704  }
  0x13   : > { %v417_v53 = vld [vmem:[%s925_s3] sm:$0xf] (!%p215_p9) }
  0x15   : > { %s244_s9 = scalar_select %p243_p10, %s790_s25, 1 }
  0x17   : > { %s555_s10 = sshll.u32 %s244_s9, 1  ;;  %s732_s9 = smov 108  }
  0x18   : > { %s246_s13 = scalar_lea.vmem %s922_s0, %s555_s10 }
  0x19   : > { %v556_v1 = vld.sshfl [vmem:[%s246_s13] sm:$0x3 pattern:$0x76325410] }
  0x1a   : > { %261 = vrot.lane.b32.xlu0 %v556_v1, %s722_s14 }
  0x8c   : > { %v262_v2 = vpop.permute.xlu0 %261 }
  0x8d   : > { %265 = vst.msk [vmem:[#allocation2] sm:$0x3] %vm264_vm2, %v262_v2 }
  0x94   : > { %v266_v4 = vld [vmem:[#allocation2] sm:$0x3] }
  0x95   : > { %v557_v5 = vcombine.low %v266_v4, %v266_v4 }
  0x97   : > { %273 = vrot.lane.b32.xlu1 %v557_v5, %s724_s15  ;;  %v270_v6 = vrot.slane %v557_v5, 6  ;;  %v275_v7 = vrot.slane %v557_v5, 2 }
  0x99   : > { %271 = vrot.lane.b32.xlu0 %v270_v6, %s725_s16 }
  0x9b   : > { %276 = vrot.lane.b32.xlu1 %v275_v7, %s726_s17 }
  0x9d   : > { %278 = vrot.lane.b32.xlu0 %v557_v5, %s728_s18 }
  0x9f   : > { %280 = vrot.lane.b32.xlu1 %v270_v6, %s729_s19 }
  0xa1   : > { %282 = vrot.lane.b32.xlu0 %v557_v5, %s730_s20 }
  0xa3   : > { %284 = vrot.lane.b32.xlu1 %v275_v7, %s731_s26 }
  0xa5   : > { %286 = vrot.lane.b32.xlu0 %v557_v5, %s732_s9 }
  0xa7   : > { %311 = vperm.xlu1 %653, %v308_v8  }
 0x109   : > { %v274_v9 = vpop.permute.xlu1 %273 }
 0x10b   : > { %v272_v10 = vpop.permute.xlu0 %271 }
 0x10c   : > { %v291_v11 = vsel %vm288_vm4, %v266_v4, %v272_v10 }
 0x10d   : > { %v277_v12 = vpop.permute.xlu1 %276  ;;  %v294_v13 = vsel %vm292_vm5, %v291_v11, %v274_v9 }
 0x10e   : > { %v297_v14 = vsel %vm295_vm6, %v294_v13, %v277_v12 }
 0x10f   : > { %579 = vmatpush3.bf16.msra.mxu0 %v297_v14  ;;  %v279_v15 = vpop.permute.xlu0 %278 }
 0x110   : > { %580 = vmatprep.subr.bf16.mxu0 %v723_v3 }
 0x111   : > { %v281_v16 = vpop.permute.xlu1 %280 }
 0x112   : > { %v301_v17 = vsel %vm288_vm4, %v279_v15, %v281_v16 }
 0x113   : > { %v283_v18 = vpop.permute.xlu0 %282 }
 0x114   : > { %v303_v19 = vsel %vm292_vm5, %v301_v17, %v283_v18 }
 0x115   : > { %v285_v20 = vpop.permute.xlu1 %284 }
 0x116   : > { %v305_v21 = vsel %vm295_vm6, %v303_v19, %v285_v20 }
 0x117   : > { %581 = vmatpush3.bf16.msra.mxu0 %v305_v21  ;;  %v287_v22 = vpop.permute.xlu0 %286 }
 0x118   : > { %582 = vmatprep.subr.bf16.mxu0 %v723_v3  ;;  %v319_v23 = vsel %vm288_vm4, %v287_v22, 0 }
 0x11b   : > { %583 = vmatpush3.bf16.msra.mxu0 %v319_v23 }
 0x11e   : > { %585 = vmatmul.mubr.msk.bf16.vlgmr.msra.gmra.mrb[0].mxu0 %vm314_vm7, %v307_v24 }
 0x126   : > { %v312_v25 = vpop.permute.xlu1 %311 }
 0x1f1   : > { %v355_v26 = vpop.f32.mrb[0].mxu0 }
 0x1f2   : > { %v356_v27 = vadd.f32 %v355_v26, %v312_v25  ;;  %v586_v28 = vpop.f32.mrb[1].mxu0 }
 0x1f3   : > { %v358_v29 = vpop.f32.mrb[2].mxu0 }
 0x1f4   : > { %vm361_vm8 = vcmp.ge.f32.partialorder %v356_v27, 0.0  ;;  %v362_v30 = vmul.f32 0.01, %v356_v27  ;;  %v587_v31 = vpop.f32.mrb[3].mxu0 }
 0x1f6   : > { %v363_v33 = vsel %vm361_vm8, %v356_v27, %v362_v30 }
 0x1f7   : > { %v371_v34 = vmul.f32 %v559_v32, %v363_v33 }
 0x1f9   : > { %v567_v35 = vpack.c.bf16 %v371_v34, %v371_v34 }
 0x1fb   : > { %376 = vrot.lane.b32.xlu0 %v567_v35, %s722_s14 }
 0x26d   : > { %v377_v36 = vpop.permute.xlu0 %376 }
 0x26e   : > { %380 = vst.msk [vmem:[#allocation2] sm:$0xf] %vm379_vm9, %v377_v36 }
 0x275   : > { %v381_v37 = vld [vmem:[#allocation2] sm:$0xf] }
 0x276   : > { %v561_v38 = vcombine.low %v381_v37, %v381_v37 }
 0x278   : > { %387 = vrot.lane.b32.xlu0 %v561_v38, %s724_s15  ;;  %385 = vrot.lane.b32.xlu1 %v561_v38, %s725_s16 }
 0x27c   : > { %391 = vrot.lane.b32.xlu0 %v561_v38, %s728_s18  ;;  %389 = vrot.lane.b32.xlu1 %v561_v38, %s726_s17  ;;  %s240_s17 = sand.u32 1, %s711_s22  }
 0x27d   : > { %s554_s18 = sshll.u32 %s240_s17, 2  ;;  %s478_s11 = scalar_lea.sflag [#allocation4], %s240_s17 }
 0x280   : > { %395 = vrot.lane.b32.xlu0 %v561_v38, %s730_s20  ;;  %393 = vrot.lane.b32.xlu1 %v561_v38, %s729_s19  ;;  %s564_s19 = sshll.u32 %s790_s25, 6  ;;  %s242_s20 = scalar_lea.vmem [#allocation3], %s554_s18 }
 0x281   : > { %s880_s10 = scalar_lea.hbm %s928_s6, %s564_s19  ;;  %s733_s25 = smov [#allocation3]  }
 0x282   : > { %s661_s13 = sshll.u32 %s733_s25, 4  ;;  %s662_s13 = int_to_ptr.vmem [resolvable:$false] %s661_s13 }
 0x283   : > { %s663_s14 = scalar_lea.vmem %s662_s13, 128 }
 0x284   : > { %399 = vrot.lane.b32.xlu0 %v561_v38, %s732_s9  ;;  %397 = vrot.lane.b32.xlu1 %v561_v38, %s731_s26  ;;  %s491_s26 = sshll.u32 %s242_s20, 4  ;;  %s882_s26 = int_to_ptr.vmem [resolvable:$true] %s491_s26 }
 0x285   : > { %s657_s12 = scalar_lea.vmem %s882_s26, 64  ;;  %p664_p0 = scmp.lt.s32.totalorder %s882_s26, %s662_s13 }
 0x286   : > { %p658_p11 = scmp.ne.s32.totalorder %s882_s26, %s657_s12  ;;  %p665_p1 = scmp.lt.s32.totalorder %s663_s14, %s657_s12 }
 0x288   : > { %421 = vperm.xlu1 %653, %v418_v39   ;;  %p659_p12 = pnand %p658_p11, %p807_p5  ;;  %p666_p2 = por %p665_p1, %p664_p0 }
 0x28a   : > { %p660_p13 = pneg %p659_p12 }
 0x28c   : > { %p667_p3 = pnand %p666_p2, %p660_p13 }
 0x2ea   : > { %v388_v40 = vpop.permute.xlu0 %387  ;;  %v386_v41 = vpop.permute.xlu1 %385 }
 0x2eb   : > { %v403_v42 = vsel %vm292_vm5, %v381_v37, %v386_v41 }
 0x2ec   : > { %589 = vmatpush3.bf16.msra.mxu1 %v403_v42 }
 0x2ed   : > { %590 = vmatprep.subr.bf16.mxu1 %v723_v3 }
 0x2ee   : > { %v392_v43 = vpop.permute.xlu0 %391  ;;  %v390_v44 = vpop.permute.xlu1 %389 }
 0x2ef   : > { %v407_v45 = vsel %vm292_vm5, %v388_v40, %v390_v44 }
 0x2f0   : > { %591 = vmatpush3.bf16.msra.mxu1 %v407_v45 }
 0x2f1   : > { %592 = vmatprep.subr.bf16.mxu1 %v723_v3 }
 0x2f2   : > { %v396_v46 = vpop.permute.xlu0 %395  ;;  %v394_v47 = vpop.permute.xlu1 %393 }
 0x2f3   : > { %v411_v48 = vsel %vm292_vm5, %v392_v43, %v394_v47 }
 0x2f4   : > { %593 = vmatpush3.bf16.msra.mxu1 %v411_v48 }
 0x2f5   : > { %594 = vmatprep.subr.bf16.mxu1 %v723_v3 }
 0x2f6   : > { %v398_v49 = vpop.permute.xlu1 %397  ;;  %v400_v51 = vpop.permute.xlu0 %399 }
 0x2f7   : > { %v415_v50 = vsel %vm292_vm5, %v396_v46, %v398_v49  ;;  %v429_v52 = vsel %vm292_vm5, %v400_v51, 0 }
 0x2f8   : > { %595 = vmatpush3.bf16.msra.mxu1 %v415_v50 }
 0x2f9   : > { %596 = vmatprep.subr.bf16.mxu1 %v723_v3 }
 0x2fc   : > { %597 = vmatpush3.bf16.msra.mxu1 %v429_v52 }
 0x2ff   : > { %599 = vmatmul.mubr.msk.bf16.vlgmr.msra.gmra.mrb[0].mxu1 %vm424_vm10, %v417_v53 }
 0x307   : > { %v422_v54 = vpop.permute.xlu1 %421 }
 0x3d2   : > { %v465_v55 = vpop.f32.mrb[0].mxu1 }
 0x3d3   : > { %v466_v56 = vadd.f32 %v465_v55, %v422_v54  ;;  %v600_v57 = vpop.f32.mrb[1].mxu1 }
 0x3d4   : > { %v468_v58 = vpop.f32.mrb[2].mxu1 }
 0x3d5   : > { %vm471_vm11 = vcmp.ge.f32.partialorder %v466_v56, 0.0  ;;  %v472_v59 = vmul.f32 0.01, %v466_v56  ;;  %v601_v60 = vpop.f32.mrb[3].mxu1 }
 0x3d7   : > { %v473_v61 = vsel %vm471_vm11, %v466_v56, %v472_v59 }
 0x3d8   : > { %v474_v62 = vpack.c.bf16 %v473_v61, %v473_v61 }
 0x3da   : > { %476 = vst.msk [vmem:[%s242_s20] sm:$0xf] %vm475_vm12, %v474_v62 }
 0x3db   : > { %670 = shalt.err (!%p667_p3)
}
 0x3dc   : > { %s671_s28 = scalar_lea.hbm %s880_s10, 64  ;;  %s675_s17 = scalar_lea.hbm %s928_s6, 128 }
 0x3dd   : > { %p672_p4 = scmp.ne.s32.totalorder %s880_s10, %s671_s28  ;;  %p676_p9 = scmp.lt.u32.totalorder %s880_s10, %s928_s6 }
 0x3de   : > { %p677_p10 = scmp.lt.u32.totalorder %s675_s17, %s671_s28  ;;  %p679_p12 = scmp.lt.u32.totalorder %s671_s28, %s880_s10 }
 0x3df   : > { %p673_p7 = pnand %p672_p4, %p807_p5 }
 0x3e0   : > { %p678_p11 = por %p677_p10, %p676_p9 }
 0x3e1   : > { %p674_p8 = pneg %p673_p7 }
 0x3e2   : > { %p680_p13 = por %p679_p12, %p678_p11 }
 0x3e4   : > { %p681_p0 = pnand %p680_p13, %p674_p8 }
 0x3e6   : > { %684 = shalt.err (!%p681_p0)
}
 0x3e7   : > { %602 = dma.vmem_to_hbm [thread:$0]  (%p807_p5), %s882_s26, 64, %s880_s10, %s478_s11  }
 0x3e8 PF: > { %p608_p1 = scmp.ge.s32.totalorder %s719_s24, 2  ;;  %s503_s20 = sand.u32 1, %s707_s21  }
 0x3e9   : > { %s504_s29 = scalar_lea.sflag [#allocation4], %s503_s20 }
 0x3ea   : > { %p605_p2 = pnand %p608_p1, %p811_p6 }
 0x3ec   : > { %702 = dma.done.wait (!%p605_p2), %s504_s29, 64  }
 0x3ed   : > { %704 = vsyncadd (!%p605_p2), %s504_s29, 4294967232  ;;  %p16_p3 = scmp.ge.s32.totalorder %s794_s27, 4   ;;  %s931_s21 = smov %s711_s22 }
 0x3ee   : > { %s932_s22 = smov %s715_s23  ;;  %s933_s23 = smov %s805_s30 }
 0x3ef   : > { %s934_s24 = smov %s794_s27  ;;  %18 = sbr.rel (!%p16_p3) target bundleno = 3 (0x3), region = 79 }
 0x3f6   :  { %509 = vsyncpa [#allocation4], 1 }
 0x3f7   :  { %511 = vsyncpa [#allocation4 + $0x1], 1 }

</bundles_post_ra>
